<compile_context>
chip_gen: v6e
topology: v6e:2x2x1
jax: 0.10.0
libtpu: 0.0.40
codegen_flags: <defaults>
</compile_context>

<pallas_src>
import functools

import jax
import jax.numpy as jnp
from jax.experimental import pallas as pl
from jax.experimental.pallas import tpu as pltpu


def _round_up(v, m):
    return (v + m - 1) // m * m


def _mlp_kernel(x_ref, w1_ref, b1_ref, w2_ref, b2_ref, o_ref):
    # Layer 1: bf16 MXU matmul with f32 accumulation; bias + ReLU in f32 (VPU).
    h = jnp.dot(x_ref[...], w1_ref[...], preferred_element_type=jnp.float32)
    h = jnp.maximum(h + b1_ref[...], 0.0)                  # (Bm, Hp) + (1, Hp)
    # Layer 2: cast activations to bf16 for the MXU, accumulate in f32.
    y = jnp.dot(h.astype(jnp.bfloat16), w2_ref[...],
                preferred_element_type=jnp.float32)
    o_ref[...] = (y + b2_ref[...]).astype(o_ref.dtype)     # (Bm, Op) + (1, Op)


@functools.partial(jax.jit, static_argnames=("block_batch",))
def red_neuronal_forward(x, w1, b1, w2, b2, *, block_batch=512):
    """x: (B, input_size) f32; returns (B, output_size) f32."""
    B, I = x.shape
    H = w1.shape[1]
    O = w2.shape[1]

    # Lane-dense padding of feature dims to 128 lanes (MXU / store granularity).
    Ip, Hp, Op = _round_up(I, 128), _round_up(H, 128), _round_up(O, 128)

    # Batch tile: multiple of 8 sublanes, capped at `block_batch` rows.
    Bm = min(block_batch, _round_up(B, 8))
    Bp = _round_up(B, Bm)
    grid = (Bp // Bm,)

    f32, bf16 = jnp.float32, jnp.bfloat16

    # One-time wrapper-side padding + bf16 cast.  Zero padding is exact:
    # padded K-columns contribute 0 to the dots, padded hidden units give
    # relu(0)=0 and hit zero rows of W2, padded output columns are sliced off.
    xp = jnp.pad(x.astype(bf16), ((0, Bp - B), (0, Ip - I)))
    w1p = jnp.pad(w1.astype(bf16), ((0, Ip - I), (0, Hp - H)))
    b1p = jnp.pad(b1.astype(f32).reshape(1, H), ((0, 0), (0, Hp - H)))
    w2p = jnp.pad(w2.astype(bf16), ((0, Hp - H), (0, Op - O)))
    b2p = jnp.pad(b2.astype(f32).reshape(1, O), ((0, 0), (0, Op - O)))

    flops = 2 * Bp * Ip * Hp + 2 * Bp * Hp * Op
    bytes_accessed = (xp.size * 2 + w1p.size * 2 + w2p.size * 2
                      + b1p.size * 4 + b2p.size * 4 + Bp * Op * 4)

    out = pl.pallas_call(
        _mlp_kernel,
        out_shape=jax.ShapeDtypeStruct((Bp, Op), f32),
        grid_spec=pltpu.PrefetchScalarGridSpec(
            num_scalar_prefetch=0,
            grid=grid,
            in_specs=[
                # x tile streams with the grid (double-buffered by Pallas).
                pl.BlockSpec((Bm, Ip), lambda i: (i, 0)),
                # Weights / biases: constant index_map -> resident in VMEM.
                pl.BlockSpec((Ip, Hp), lambda i: (0, 0)),
                pl.BlockSpec((1, Hp), lambda i: (0, 0)),
                pl.BlockSpec((Hp, Op), lambda i: (0, 0)),
                pl.BlockSpec((1, Op), lambda i: (0, 0)),
            ],
            out_specs=pl.BlockSpec((Bm, Op), lambda i: (i, 0)),
        ),
        compiler_params=pltpu.CompilerParams(
            # Batch tiles are independent -> shard across TCs on v7x megacore.
            dimension_semantics=("parallel",),
            # Explicit VMEM budget; well below v7x's 64 MiB physical VMEM and
            # ample for Bm<=512 tiles + resident (padded) weights.
            vmem_limit_bytes=32 * 1024 * 1024,
        ),
        cost_estimate=pl.CostEstimate(
            flops=flops, transcendentals=0, bytes_accessed=bytes_accessed),
    )(xp, w1p, b1p, w2p, b2p)

    # Strip batch / output padding.
    return out[:B, :O]


def init_params(key, input_size, hidden_size, output_size, dtype=jnp.float32):
    """Deterministic init mimicking nn.Linear's uniform(-1/sqrt(fan_in), +1/sqrt(fan_in))."""
    k1, k2, k3, k4 = jax.random.split(key, 4)
    lim1 = 1.0 / (input_size ** 0.5)
    lim2 = 1.0 / (hidden_size ** 0.5)
    w1 = jax.random.uniform(k1, (input_size, hidden_size), dtype, -lim1, lim1)
    b1 = jax.random.uniform(k2, (1, hidden_size), dtype, -lim1, lim1)
    w2 = jax.random.uniform(k3, (hidden_size, output_size), dtype, -lim2, lim2)
    b2 = jax.random.uniform(k4, (1, output_size), dtype, -lim2, lim2)
    return w1, b1, w2, b2


if __name__ == "__main__":
    # NOTE: at these toy shapes a standalone Pallas call is dominated by fixed
    # per-call overhead; the kernel is written so it scales to large batches
    # (streamed batch tiles, resident weights) without changes.
    input_size, hidden_size, output_size = 16, 32, 4
    batch = 8

    key = jax.random.PRNGKey(0)
    k_x, k_p = jax.random.split(key)
    x = jax.random.normal(k_x, (batch, input_size), dtype=jnp.float32)
    w1, b1, w2, b2 = init_params(k_p, input_size, hidden_size, output_size)

    out = jax.block_until_ready(red_neuronal_forward(x, w1, b1, w2, b2))
    assert out.shape == (batch, output_size)

    # Reference performing the same math (bf16 MXU inputs, f32 accumulation,
    # f32 bias + ReLU) so the tolerance can stay tight despite bf16 rounding.
    xb, w1b, w2b = (a.astype(jnp.bfloat16) for a in (x, w1, w2))
    h_ref = jnp.dot(xb, w1b, preferred_element_type=jnp.float32) + b1
    h_ref = jnp.maximum(h_ref, 0.0)
    ref = jnp.dot(h_ref.astype(jnp.bfloat16), w2b,
                  preferred_element_type=jnp.float32) + b2
    assert jnp.allclose(out, ref, atol=1e-4, rtol=1e-4), float(
        jnp.max(jnp.abs(out - ref)))

    # Sanity vs. the pure-f32 module semantics (loose tol for bf16 rounding).
    ref_f32 = jnp.maximum(x @ w1 + b1, 0.0) @ w2 + b2
    assert jnp.allclose(out, ref_f32, atol=5e-2, rtol=5e-2), float(
        jnp.max(jnp.abs(out - ref_f32)))

    print("KERNEL_OK")
</pallas_src>

<mosaic_0001>
module attributes {stable_mosaic.version = 11 : i64} {
  func.func @_mlp_kernel(%arg0: i32, %arg1: memref<8x128xbf16, #tpu.memory_space<vmem>>, %arg2: memref<128x128xbf16, #tpu.memory_space<vmem>>, %arg3: memref<1x128xf32, #tpu.memory_space<vmem>>, %arg4: memref<128x128xbf16, #tpu.memory_space<vmem>>, %arg5: memref<1x128xf32, #tpu.memory_space<vmem>>, %arg6: memref<8x128xf32, #tpu.memory_space<vmem>>) attributes {dimension_semantics = [#tpu.dimension_semantics<parallel>], iteration_bounds = array<i64: 1>, scalar_prefetch = 0 : i64, scratch_operands = 0 : i64, tpu.core_type = #tpu.core_type<tc>, window_params = [{transform_indices = @transform_0, window_bounds = array<i64: 8, 128>}, {pipeline_mode = #tpu.pipeline_mode<synchronous>, transform_indices = @transform_1, window_bounds = array<i64: 128, 128>}, {pipeline_mode = #tpu.pipeline_mode<synchronous>, transform_indices = @transform_2, window_bounds = array<i64: 1, 128>}, {pipeline_mode = #tpu.pipeline_mode<synchronous>, transform_indices = @transform_3, window_bounds = array<i64: 128, 128>}, {pipeline_mode = #tpu.pipeline_mode<synchronous>, transform_indices = @transform_4, window_bounds = array<i64: 1, 128>}, {transform_indices = @transform_5, window_bounds = array<i64: 8, 128>}]} {
    %c0 = arith.constant 0 : index
    %c0_0 = arith.constant 0 : index
    %0 = vector.load %arg1[%c0, %c0_0] : memref<8x128xbf16, #tpu.memory_space<vmem>>, vector<8x128xbf16>
    %c0_1 = arith.constant 0 : index
    %c0_2 = arith.constant 0 : index
    %1 = vector.load %arg2[%c0_1, %c0_2] : memref<128x128xbf16, #tpu.memory_space<vmem>>, vector<128x128xbf16>
    %cst = arith.constant dense<0.000000e+00> : vector<8x128xf32>
    %2 = tpu.matmul %0, %1, %cst {dimension_numbers = #tpu.dot_dimension_numbers<[1], [0], [0], [1], [0, 0, 1, 1], [], []>} : vector<8x128xbf16>, vector<128x128xbf16>, vector<8x128xf32> -> vector<8x128xf32>
    %c0_3 = arith.constant 0 : index
    %c0_4 = arith.constant 0 : index
    %3 = vector.load %arg3[%c0_3, %c0_4] : memref<1x128xf32, #tpu.memory_space<vmem>>, vector<1x128xf32>
    %4 = vector.broadcast %3 : vector<1x128xf32> to vector<8x128xf32>
    %5 = arith.addf %2, %4 : vector<8x128xf32>
    %cst_5 = arith.constant 0.000000e+00 : f32
    %6 = vector.broadcast %cst_5 : f32 to vector<8x128xf32>
    %7 = arith.maximumf %5, %6 : vector<8x128xf32>
    %8 = arith.truncf %7 : vector<8x128xf32> to vector<8x128xbf16>
    %c0_6 = arith.constant 0 : index
    %c0_7 = arith.constant 0 : index
    %9 = vector.load %arg4[%c0_6, %c0_7] : memref<128x128xbf16, #tpu.memory_space<vmem>>, vector<128x128xbf16>
    %cst_8 = arith.constant dense<0.000000e+00> : vector<8x128xf32>
    %10 = tpu.matmul %8, %9, %cst_8 {dimension_numbers = #tpu.dot_dimension_numbers<[1], [0], [0], [1], [0, 0, 1, 1], [], []>} : vector<8x128xbf16>, vector<128x128xbf16>, vector<8x128xf32> -> vector<8x128xf32>
    %c0_9 = arith.constant 0 : index
    %c0_10 = arith.constant 0 : index
    %11 = vector.load %arg5[%c0_9, %c0_10] : memref<1x128xf32, #tpu.memory_space<vmem>>, vector<1x128xf32>
    %12 = vector.broadcast %11 : vector<1x128xf32> to vector<8x128xf32>
    %13 = arith.addf %10, %12 : vector<8x128xf32>
    %c0_11 = arith.constant 0 : index
    %c0_12 = arith.constant 0 : index
    %14 = vector.load %arg6[%c0_11, %c0_12] : memref<8x128xf32, #tpu.memory_space<vmem>>, vector<8x128xf32>
    tpu.vector_store %arg6[%c0_11, %c0_12], %13 {strides = array<i32>} : memref<8x128xf32, #tpu.memory_space<vmem>>, vector<8x128xf32>,
    return
  }
  func.func @transform_0(%arg0: i32) -> (i32, i32) {
    %c0_i32 = arith.constant 0 : i32
    %c0_i32_0 = arith.constant 0 : i32
    return %arg0, %c0_i32 : i32, i32
  }
  func.func @transform_1(%arg0: i32) -> (i32, i32) {
    %c0_i32 = arith.constant 0 : i32
    %c0_i32_0 = arith.constant 0 : i32
    %c0_i32_1 = arith.constant 0 : i32
    return %c0_i32, %c0_i32_0 : i32, i32
  }
  func.func @transform_2(%arg0: i32) -> (i32, i32) {
    %c0_i32 = arith.constant 0 : i32
    %c0_i32_0 = arith.constant 0 : i32
    %c0_i32_1 = arith.constant 0 : i32
    return %c0_i32, %c0_i32_0 : i32, i32
  }
  func.func @transform_3(%arg0: i32) -> (i32, i32) {
    %c0_i32 = arith.constant 0 : i32
    %c0_i32_0 = arith.constant 0 : i32
    %c0_i32_1 = arith.constant 0 : i32
    return %c0_i32, %c0_i32_0 : i32, i32
  }
  func.func @transform_4(%arg0: i32) -> (i32, i32) {
    %c0_i32 = arith.constant 0 : i32
    %c0_i32_0 = arith.constant 0 : i32
    %c0_i32_1 = arith.constant 0 : i32
    return %c0_i32, %c0_i32_0 : i32, i32
  }
  func.func @transform_5(%arg0: i32) -> (i32, i32) {
    %c0_i32 = arith.constant 0 : i32
    %c0_i32_0 = arith.constant 0 : i32
    return %arg0, %c0_i32 : i32, i32
  }
}

</mosaic_0001>

<bundles_post_ra>
// kernel: red_neuronal_forward.1
= control target key start
LH: loop header
LB: loop body
LE: loop exit
PB: predicated region body
PF: predicated region fallthrough
CT: control target
= control target key end

     0   :  { %v345_v0 = vmov 0.0   ;;  %vm346_vm0 = vmmov 0   ;;  %s437_s1 = inlined_call_operand.vmem [shape: bf16[128,128], index: 1, kind: input, shape index: {}]   ;;  %s438_s3 = inlined_call_operand.vmem [shape: bf16[128,128], index: 3, kind: input, shape index: {}]   ;;  %s439_s0 = inlined_call_operand.vmem [shape: bf16[8,128], index: 0, kind: input, shape index: {}]   ;;  %s440_s2 = inlined_call_operand.vmem [shape: f32[1,128], index: 2, kind: input, shape index: {}]   ;;  %s441_s4 = inlined_call_operand.vmem [shape: f32[1,128], index: 4, kind: input, shape index: {}]   ;;  %s442_s5 = inlined_call_operand.vmem [shape: f32[8,128], index: 5, kind: output, shape index: {}]  }
   0x1   :  { %287 = vmatprep.subr.bf16.mxu0 %v345_v0  ;;  %v329_v1 = vld [vmem:[%s437_s1 + $0x38] sm:$0xff]   ;;  %303 = vmatprep.mubr.msk.bf16.mxu0 %vm346_vm0, %v345_v0  ;;  %v330_v2 = vld [vmem:[%s437_s1 + $0x30] sm:$0xff]   ;;  %v331_v3 = vld [vmem:[%s437_s1 + $0x28] sm:$0xff]  }
   0x2   :  { %307 = vmatprep.subr.bf16.mxu1 %v345_v0  ;;  %323 = vmatprep.mubr.msk.bf16.mxu1 %vm346_vm0, %v345_v0  ;;  %v337_v4 = vld [vmem:[%s438_s3 + $0x38] sm:$0xff]   ;;  %v332_v5 = vld [vmem:[%s437_s1 + $0x20] sm:$0xff]   ;;  %v338_v6 = vld [vmem:[%s438_s3 + $0x30] sm:$0xff]  }
   0x3   :  { %288 = vmatpush3.bf16.msra.mxu0 %v329_v1  ;;  %308 = vmatpush3.bf16.msra.mxu1 %v337_v4  ;;  %v333_v7 = vld [vmem:[%s437_s1 + $0x18] sm:$0xff]   ;;  %v339_v8 = vld [vmem:[%s438_s3 + $0x28] sm:$0xff]   ;;  %v334_v9 = vld [vmem:[%s437_s1 + $0x10] sm:$0xff]  }
   0x4   :  { %289 = vmatprep.subr.bf16.mxu0 %v345_v0  ;;  %309 = vmatprep.subr.bf16.mxu1 %v345_v0  ;;  %v340_v10 = vld [vmem:[%s438_s3 + $0x20] sm:$0xff]   ;;  %v335_v11 = vld [vmem:[%s437_s1 + $0x8] sm:$0xff]   ;;  %v341_v12 = vld [vmem:[%s438_s3 + $0x18] sm:$0xff]  }
   0x5   :  { %v336_v13 = vld [vmem:[%s437_s1] sm:$0xff]   ;;  %v342_v14 = vld [vmem:[%s438_s3 + $0x10] sm:$0xff]   ;;  %v343_v16 = vld [vmem:[%s438_s3 + $0x8] sm:$0xff]  }
   0x6   :  { %v21_v15 = vld [vmem:[%s439_s0] sm:$0xf] }
   0x7   :  { %290 = vmatpush3.bf16.msra.mxu0 %v330_v2  ;;  %310 = vmatpush3.bf16.msra.mxu1 %v338_v6  ;;  %v344_v17 = vld [vmem:[%s438_s3] sm:$0xff]  }
   0x8   :  { %291 = vmatprep.subr.bf16.mxu0 %v345_v0  ;;  %311 = vmatprep.subr.bf16.mxu1 %v345_v0  ;;  %v251_v18 = vld [vmem:[%s440_s2] ss:$0 sm:$0xff] }
   0x9   :  { %v260_v26 = vld [vmem:[%s441_s4] ss:$0 sm:$0xff] }
   0xb   :  { %292 = vmatpush3.bf16.msra.mxu0 %v331_v3  ;;  %312 = vmatpush3.bf16.msra.mxu1 %v339_v8 }
   0xc   :  { %293 = vmatprep.subr.bf16.mxu0 %v345_v0  ;;  %313 = vmatprep.subr.bf16.mxu1 %v345_v0 }
   0xf   :  { %294 = vmatpush3.bf16.msra.mxu0 %v332_v5  ;;  %314 = vmatpush3.bf16.msra.mxu1 %v340_v10 }
  0x10   :  { %295 = vmatprep.subr.bf16.mxu0 %v345_v0  ;;  %315 = vmatprep.subr.bf16.mxu1 %v345_v0 }
  0x13   :  { %296 = vmatpush3.bf16.msra.mxu0 %v333_v7  ;;  %316 = vmatpush3.bf16.msra.mxu1 %v341_v12 }
  0x14   :  { %297 = vmatprep.subr.bf16.mxu0 %v345_v0  ;;  %317 = vmatprep.subr.bf16.mxu1 %v345_v0 }
  0x17   :  { %298 = vmatpush3.bf16.msra.mxu0 %v334_v9  ;;  %318 = vmatpush3.bf16.msra.mxu1 %v342_v14 }
  0x18   :  { %299 = vmatprep.subr.bf16.mxu0 %v345_v0  ;;  %319 = vmatprep.subr.bf16.mxu1 %v345_v0 }
  0x1b   :  { %300 = vmatpush3.bf16.msra.mxu0 %v335_v11  ;;  %320 = vmatpush3.bf16.msra.mxu1 %v343_v16 }
  0x1c   :  { %301 = vmatprep.subr.bf16.mxu0 %v345_v0  ;;  %321 = vmatprep.subr.bf16.mxu1 %v345_v0 }
  0x1f   :  { %302 = vmatpush3.bf16.msra.mxu0 %v336_v13  ;;  %322 = vmatpush3.bf16.msra.mxu1 %v344_v17 }
  0x22   :  { %304 = vmatmul.mubr.bf16.vlgmr.msra.gmra.mxu0 %v21_v15 }
  0xe2   :  { %v127_v19 = vpop.f32.mrf.mxu0 }
  0xe3   :  { %v128_v20 = vadd.f32 %v251_v18, %v127_v19 }
  0xe4   :  { %v305_v21 = vpop.f32.mrf.mxu0 }
  0xe5   :  { %v133_v22 = vmax.f32 %v128_v20, 0.0 }
  0xe6   :  { %v130_v23 = vpop.f32.mrf.mxu0 }
  0xe7   :  { %v134_v24 = vpack.c.bf16 %v133_v22, %v133_v22 }
  0xe8   :  { %v306_v25 = vpop.f32.mrf.mxu0 }
  0xe9   :  { %324 = vmatmul.mubr.bf16.vlgmr.msra.gmra.mxu1 %v134_v24 }
 0x1a9   :  { %v240_v27 = vpop.f32.mrf.mxu1 }
 0x1aa   :  { %v241_v28 = vadd.f32 %v260_v26, %v240_v27 }
 0x1ab   :  { %v325_v29 = vpop.f32.mrf.mxu1 }
 0x1ac   :  { %246 = vst [vmem:[%s442_s5] sm:$0xff] %v241_v28 }
 0x1ad   :  { %v243_v30 = vpop.f32.mrf.mxu1 }
 0x1af   :  { %v326_v31 = vpop.f32.mrf.mxu1 }

</bundles_post_ra>
